<compile_context>
chip_gen: v7x
topology: tpu7x:2x2x1
jax: 0.10.0
libtpu: 0.0.40
codegen_flags: <defaults>
</compile_context>

<pallas_src>
import functools

import numpy as np
import jax
import jax.numpy as jnp
from jax.experimental import pallas as pl
from jax.experimental.pallas import tpu as pltpu


def _pyr_matrix(n_out: int, n_in: int) -> np.ndarray:
    """1D pyrDown operator: 5-tap Gaussian [1,4,6,4,1]/16, BORDER_REFLECT_101,
    stride-2 downsample.  out[o] = sum_i A[o, i] * in[i]."""
    w = np.array([1.0, 4.0, 6.0, 4.0, 1.0], dtype=np.float64) / 16.0
    A = np.zeros((n_out, n_in), dtype=np.float64)
    for o in range(n_out):
        for k in range(5):
            i = 2 * o + k - 2
            if i < 0:                      # reflect_101 (no edge duplication)
                i = -i
            if i >= n_in:
                i = 2 * n_in - 2 - i
            A[o, i] += w[k]
    return A


def _align(x: int, m: int) -> int:
    return (x + m - 1) // m * m


def _pick_bm(m: int) -> int:
    """Rows of the (B*C, H*W) slab per grid step.  Must be a multiple of 8
    (sublane rule) dividing m; otherwise fall back to the full array (valid
    because block == full dim)."""
    for bm in (512, 256, 128, 64, 32, 16, 8):
        if m % bm == 0:
            return bm
    return m


def _make_kernel(n_down: int, flat_dims, lpad: int):
    inv255 = np.float32(1.0 / 255.0)
    used = sum(flat_dims)

    def kernel(*refs):
        x_ref = refs[0]
        k_refs = refs[1:1 + n_down]
        o_ref = refs[1 + n_down]
        rows = x_ref.shape[0]

        # ToPILImage: pic.mul(255).byte() -> truncation to uint8 values.
        g = jnp.floor(jnp.clip(x_ref[...], 0.0, 1.0) * 255.0)     # (bm, Hin*Win)
        segs = [g]
        for k_ref in k_refs:                                      # static unroll (3 levels)
            # Whole pyrDown level as ONE matmul against kron(Ah, Aw)^T.
            y = jnp.dot(g, k_ref[...],
                        preferred_element_type=jnp.float32,
                        precision=jax.lax.Precision.HIGHEST)
            # cv2 fixed-point rounding ((acc + 128) >> 8) == floor(y + 0.5)
            g = jnp.floor(y + 0.5)
            segs.append(g)
        if lpad > used:
            segs.append(jnp.zeros((rows, lpad - used), jnp.float32))
        # ToTensor (/255) + single lane-dense packed store (one writeback DMA).
        o_ref[...] = jnp.concatenate(segs, axis=-1) * inv255

    return kernel


@functools.partial(jax.jit, static_argnames=("levels",))
def gaussian_pyramid(batch: jnp.ndarray, levels: int = 4):
    """Forward pass of GaussianPyramid(levels=4). batch: (B, 3, H, W) f32 in [0,1]."""
    assert levels == 4, "reference forward hard-codes 4 pyramid levels (G0..G3)"
    B, C, H, W = batch.shape
    dims = [(H, W)]
    for _ in range(levels - 1):
        h, w = dims[-1]
        dims.append(((h + 1) // 2, (w + 1) // 2))
    flat_dims = [h * w for h, w in dims]
    lpad = _align(sum(flat_dims), 128)        # lane-dense packed output width

    # Host-side constants: per-level kron(Ah, Aw)^T, exact dyadic weights (n/256).
    krons = []
    for lvl in range(levels - 1):
        hin, win = dims[lvl]
        hout, wout = dims[lvl + 1]
        K = np.kron(_pyr_matrix(hout, hin), _pyr_matrix(wout, win))   # (HoWo, HiWi)
        krons.append(jnp.asarray(np.ascontiguousarray(K.T), dtype=jnp.float32))

    M = B * C
    bm = _pick_bm(M)
    grid = (M // bm,)
    x2d = batch.reshape(M, H * W)             # free contiguous reshape to matmul layout

    kernel = _make_kernel(levels - 1, flat_dims, lpad)

    in_specs = [pl.BlockSpec((bm, flat_dims[0]), lambda i: (i, 0))]
    for kt in krons:                          # full-array constants: DMA'd once, never sliced
        in_specs.append(pl.BlockSpec(kt.shape, lambda i: (0, 0)))
    out_spec = pl.BlockSpec((bm, lpad), lambda i: (i, 0))

    packed = pl.pallas_call(
        kernel,
        out_shape=jax.ShapeDtypeStruct((M, lpad), jnp.float32),
        grid=grid,
        in_specs=in_specs,
        out_specs=out_spec,
        compiler_params=pltpu.CompilerParams(dimension_semantics=("parallel",)),
    )(x2d, *krons)

    outs = {}
    off = 0
    for i, (h, w) in enumerate(dims):
        n = h * w
        outs[f"level{i + 1}"] = packed[:, off:off + n].reshape(B, C, h, w)
        off += n
    return outs


# ----------------------------------------------------------------------------- test
def _np_pyrdown(g: np.ndarray) -> np.ndarray:
    """Independent numpy reference of cv2.pyrDown on a (H, W) array of uint8 values."""
    k = np.array([1.0, 4.0, 6.0, 4.0, 1.0])
    K = np.outer(k, k) / 256.0
    H, W = g.shape
    Ho, Wo = (H + 1) // 2, (W + 1) // 2
    p = np.pad(g, 2, mode="reflect")           # == BORDER_REFLECT_101
    out = np.zeros((Ho, Wo))
    for oh in range(Ho):
        for ow in range(Wo):
            out[oh, ow] = np.sum(p[2 * oh:2 * oh + 5, 2 * ow:2 * ow + 5] * K)
    return np.floor(out + 0.5)


if __name__ == "__main__":
    key = jax.random.PRNGKey(0)
    # B=2, C=3 (forward converts to RGB), 16x16 patches -> levels 16, 8, 4, 2
    x = jax.random.uniform(key, (2, 3, 16, 16), dtype=jnp.float32)

    out = gaussian_pyramid(x, levels=4)
    jax.block_until_ready(out)

    assert out["level1"].shape == (2, 3, 16, 16)
    assert out["level2"].shape == (2, 3, 8, 8)
    assert out["level3"].shape == (2, 3, 4, 4)
    assert out["level4"].shape == (2, 3, 2, 2)

    # Numerical check against an independent numpy reference of the forward pass.
    # Quantization step done in float32 so it matches the on-device f32 multiply
    # bit-for-bit; everything downstream is exact dyadic arithmetic.
    x_f32 = np.asarray(x, dtype=np.float32)
    g = np.floor(np.clip(x_f32, 0.0, 1.0) * np.float32(255.0)).astype(np.float64)
    ref_levels = [g / 255.0]
    for _ in range(3):
        g = np.stack([np.stack([_np_pyrdown(g[b, c]) for c in range(g.shape[1])])
                      for b in range(g.shape[0])])
        ref_levels.append(g / 255.0)
    for i, name in enumerate(["level1", "level2", "level3", "level4"]):
        err = np.max(np.abs(np.asarray(out[name], dtype=np.float64) - ref_levels[i]))
        assert err < 1e-5, (name, float(err))

    print("KERNEL_OK")
</pallas_src>

<mosaic_0001>
module attributes {stable_mosaic.version = 11 : i64} {
  func.func @kernel(%arg0: i32, %arg1: memref<6x256xf32, #tpu.memory_space<vmem>>, %arg2: memref<256x64xf32, #tpu.memory_space<vmem>>, %arg3: memref<64x16xf32, #tpu.memory_space<vmem>>, %arg4: memref<16x4xf32, #tpu.memory_space<vmem>>, %arg5: memref<6x384xf32, #tpu.memory_space<vmem>>) attributes {dimension_semantics = [#tpu.dimension_semantics<parallel>], iteration_bounds = array<i64: 1>, scalar_prefetch = 0 : i64, scratch_operands = 0 : i64, tpu.core_type = #tpu.core_type<tc>, window_params = [{transform_indices = @transform_0, window_bounds = array<i64: 6, 256>}, {pipeline_mode = #tpu.pipeline_mode<synchronous>, transform_indices = @transform_1, window_bounds = array<i64: 256, 64>}, {pipeline_mode = #tpu.pipeline_mode<synchronous>, transform_indices = @transform_2, window_bounds = array<i64: 64, 16>}, {pipeline_mode = #tpu.pipeline_mode<synchronous>, transform_indices = @transform_3, window_bounds = array<i64: 16, 4>}, {transform_indices = @transform_4, window_bounds = array<i64: 6, 384>}]} {
    %c0 = arith.constant 0 : index
    %c0_0 = arith.constant 0 : index
    %0 = vector.load %arg1[%c0, %c0_0] : memref<6x256xf32, #tpu.memory_space<vmem>>, vector<6x256xf32>
    %cst = arith.constant 0.000000e+00 : f32
    %cst_1 = arith.constant 1.000000e+00 : f32
    %1 = vector.broadcast %cst : f32 to vector<6x256xf32>
    %2 = arith.maximumf %1, %0 : vector<6x256xf32>
    %3 = vector.broadcast %cst_1 : f32 to vector<6x256xf32>
    %4 = arith.minimumf %3, %2 : vector<6x256xf32>
    %cst_2 = arith.constant 2.550000e+02 : f32
    %5 = vector.broadcast %cst_2 : f32 to vector<6x256xf32>
    %6 = arith.mulf %4, %5 : vector<6x256xf32>
    %7 = math.floor %6 : vector<6x256xf32>
    %c0_3 = arith.constant 0 : index
    %c0_4 = arith.constant 0 : index
    %8 = vector.load %arg2[%c0_3, %c0_4] : memref<256x64xf32, #tpu.memory_space<vmem>>, vector<256x64xf32>
    %cst_5 = arith.constant dense<0.000000e+00> : vector<6x64xf32>
    %9 = tpu.matmul %7, %8, %cst_5 {dimension_numbers = #tpu.dot_dimension_numbers<[1], [0], [0], [1], [0, 0, 1, 1], [], []>, precision = #tpu.contract_precision<fp32>} : vector<6x256xf32>, vector<256x64xf32>, vector<6x64xf32> -> vector<6x64xf32>
    %cst_6 = arith.constant 5.000000e-01 : f32
    %10 = vector.broadcast %cst_6 : f32 to vector<6x64xf32>
    %11 = arith.addf %9, %10 : vector<6x64xf32>
    %12 = math.floor %11 : vector<6x64xf32>
    %c0_7 = arith.constant 0 : index
    %c0_8 = arith.constant 0 : index
    %13 = vector.load %arg3[%c0_7, %c0_8] : memref<64x16xf32, #tpu.memory_space<vmem>>, vector<64x16xf32>
    %cst_9 = arith.constant dense<0.000000e+00> : vector<6x16xf32>
    %14 = tpu.matmul %12, %13, %cst_9 {dimension_numbers = #tpu.dot_dimension_numbers<[1], [0], [0], [1], [0, 0, 1, 1], [], []>, precision = #tpu.contract_precision<fp32>} : vector<6x64xf32>, vector<64x16xf32>, vector<6x16xf32> -> vector<6x16xf32>
    %cst_10 = arith.constant 5.000000e-01 : f32
    %15 = vector.broadcast %cst_10 : f32 to vector<6x16xf32>
    %16 = arith.addf %14, %15 : vector<6x16xf32>
    %17 = math.floor %16 : vector<6x16xf32>
    %c0_11 = arith.constant 0 : index
    %c0_12 = arith.constant 0 : index
    %18 = vector.load %arg4[%c0_11, %c0_12] : memref<16x4xf32, #tpu.memory_space<vmem>>, vector<16x4xf32>
    %cst_13 = arith.constant dense<0.000000e+00> : vector<6x4xf32>
    %19 = tpu.matmul %17, %18, %cst_13 {dimension_numbers = #tpu.dot_dimension_numbers<[1], [0], [0], [1], [0, 0, 1, 1], [], []>, precision = #tpu.contract_precision<fp32>} : vector<6x16xf32>, vector<16x4xf32>, vector<6x4xf32> -> vector<6x4xf32>
    %cst_14 = arith.constant 5.000000e-01 : f32
    %20 = vector.broadcast %cst_14 : f32 to vector<6x4xf32>
    %21 = arith.addf %19, %20 : vector<6x4xf32>
    %22 = math.floor %21 : vector<6x4xf32>
    %cst_15 = arith.constant 0.000000e+00 : f32
    %23 = vector.broadcast %cst_15 : f32 to vector<6x44xf32>
    %24 = tpu.concatenate %7, %12, %17, %22, %23 in 1 : vector<6x256xf32>, vector<6x64xf32>, vector<6x16xf32>, vector<6x4xf32>, vector<6x44xf32> -> vector<6x384xf32>
    %cst_16 = arith.constant 0.00392156886 : f32
    %25 = vector.broadcast %cst_16 : f32 to vector<6x384xf32>
    %26 = arith.mulf %24, %25 : vector<6x384xf32>
    %c0_17 = arith.constant 0 : index
    %c0_18 = arith.constant 0 : index
    %27 = vector.load %arg5[%c0_17, %c0_18] : memref<6x384xf32, #tpu.memory_space<vmem>>, vector<6x384xf32>
    tpu.vector_store %arg5[%c0_17, %c0_18], %26 {strides = array<i32>} : memref<6x384xf32, #tpu.memory_space<vmem>>, vector<6x384xf32>,
    return
  }
  func.func @transform_0(%arg0: i32) -> (i32, i32) {
    %c0_i32 = arith.constant 0 : i32
    %c0_i32_0 = arith.constant 0 : i32
    return %arg0, %c0_i32 : i32, i32
  }
  func.func @transform_1(%arg0: i32) -> (i32, i32) {
    %c0_i32 = arith.constant 0 : i32
    %c0_i32_0 = arith.constant 0 : i32
    %c0_i32_1 = arith.constant 0 : i32
    return %c0_i32, %c0_i32_0 : i32, i32
  }
  func.func @transform_2(%arg0: i32) -> (i32, i32) {
    %c0_i32 = arith.constant 0 : i32
    %c0_i32_0 = arith.constant 0 : i32
    %c0_i32_1 = arith.constant 0 : i32
    return %c0_i32, %c0_i32_0 : i32, i32
  }
  func.func @transform_3(%arg0: i32) -> (i32, i32) {
    %c0_i32 = arith.constant 0 : i32
    %c0_i32_0 = arith.constant 0 : i32
    %c0_i32_1 = arith.constant 0 : i32
    return %c0_i32, %c0_i32_0 : i32, i32
  }
  func.func @transform_4(%arg0: i32) -> (i32, i32) {
    %c0_i32 = arith.constant 0 : i32
    %c0_i32_0 = arith.constant 0 : i32
    return %arg0, %c0_i32 : i32, i32
  }
}

</mosaic_0001>

<bundles_post_ra>
// kernel: gaussian_pyramid.1
= control target key start
LH: loop header
LB: loop body
LE: loop exit
PB: predicated region body
PF: predicated region fallthrough
CT: control target
= control target key end

     0   :  { %9 = vsyncpa [#allocation3], 0  ;;  %s2749_s15 = smov [#allocation2]   ;;  %s3360_s0 = inlined_call_operand.vmem [shape: f32[6,256], index: 0, kind: input, shape index: {}]   ;;  %s3361_s1 = inlined_call_operand.hbm [shape: f32[256,64], index: 1, kind: input, shape index: {}]   ;;  %s3362_s2 = inlined_call_operand.vmem [shape: f32[64,16], index: 2, kind: input, shape index: {}]   ;;  %s3363_s3 = inlined_call_operand.vmem [shape: f32[16,4], index: 3, kind: input, shape index: {}]   ;;  %s3364_s4 = inlined_call_operand.vmem [shape: f32[6,384], index: 4, kind: output, shape index: {}]  }
   0x1   :  { %s17_s16 = sshll.u32 %s2749_s15, 4  ;;  %s2725_s19 = scalar_lea.hbm %s3361_s1, 4096  ;;  %s18_s16 = int_to_ptr.vmem [resolvable:$true] %s17_s16 }
   0x2   :  { %p2726_p0 = scmp.ne.s32.totalorder %s3361_s1, %s2725_s19  ;;  %p2729_p1 = scmp.lt.u32.totalorder %s2725_s19, %s3361_s1 }
   0x4   :  { %p2731_p2 = pnand %p2729_p1, %p2726_p0 }
   0x6   :  { %2734 = shalt.err (!%p2731_p2)
}
   0x7   :  { %s2735_s24 = scalar_lea.vmem %s18_s16, 4096  ;;  %p2740_p4 = scmp.lt.s32.totalorder %s18_s16, %s18_s16 }
   0x8   :  { %p2736_p3 = scmp.ne.s32.totalorder %s18_s16, %s2735_s24  ;;  %p2741_p5 = scmp.lt.s32.totalorder %s2735_s24, %s2735_s24 }
   0xa   :  { %p2742_p6 = por %p2741_p5, %p2740_p4 }
   0xc   :  { %p2743_p7 = pnand %p2742_p6, %p2736_p3 }
   0xe   :  { %2746 = shalt.err (!%p2743_p7)
}
   0xf   :  { %s2750_s25 = smov 128   ;;  %s2751_s26 = smov 8  }
  0x10   :  { %23 = dma.hbm_to_vmem [thread:$0]  %s3361_s1, 4096, %s18_s16, [#allocation3], %s2750_s25, %s2750_s25, %s2751_s26  }
  0x11   :  { %2747 = dma.done.wait [#allocation3], 4096  }
  0x12   :  { %2748 = vsyncadd [#allocation3], 4294963200  ;;  %v57_v0 = vld [vmem:[#allocation2 + $0x80] sm:$0xff]  ;;  %v58_v1 = vld [vmem:[#allocation2 + $0x88] sm:$0xff]  ;;  %vm2753_vm0 = vmmov 0   ;;  %vm944_vm1 = vcmask 523264  }
  0x13   :  { %v41_v2 = vld [vmem:[#allocation2] sm:$0xff]  ;;  %v122_v3 = vand.u32 4294901760, %v57_v0  ;;  %v125_v4 = vand.u32 4294901760, %v58_v1  ;;  %v42_v5 = vld [vmem:[#allocation2 + $0x8] sm:$0xff]  ;;  %v59_v7 = vld [vmem:[#allocation2 + $0x90] sm:$0xff]  ;;  %vm1488_vm2 = vcmask 130048  }
  0x14   :  { %v74_v6 = vand.u32 4294901760, %v41_v2  ;;  %v60_v8 = vld [vmem:[#allocation2 + $0x98] sm:$0xff]  ;;  %v77_v9 = vand.u32 4294901760, %v42_v5  ;;  %v128_v10 = vand.u32 4294901760, %v59_v7  ;;  %v43_v12 = vld [vmem:[#allocation2 + $0x10] sm:$0xff]  ;;  %v61_v14 = vld [vmem:[#allocation2 + $0xa0] sm:$0xff] }
  0x15   :  { %v131_v11 = vand.u32 4294901760, %v60_v8  ;;  %v44_v13 = vld [vmem:[#allocation2 + $0x18] sm:$0xff]  ;;  %v2794_v15 = vpack.c.bf16 %v125_v4, %v122_v3  ;;  %v2796_v16 = vsub.f32 %v57_v0, %v122_v3  ;;  %v2798_v17 = vsub.f32 %v58_v1, %v125_v4  ;;  %v62_v18 = vld [vmem:[#allocation2 + $0xa8] sm:$0xff]  ;;  %v45_v19 = vld [vmem:[#allocation2 + $0x20] sm:$0xff]  ;;  %s2756_s28 = smov 80  }
  0x16   :  { %v46_v20 = vld [vmem:[#allocation2 + $0x28] sm:$0xff]  ;;  %v2800_v21 = vpack.c.bf16 %v77_v9, %v74_v6  ;;  %v2802_v22 = vsub.f32 %v41_v2, %v74_v6  ;;  %v2804_v23 = vsub.f32 %v42_v5, %v77_v9  ;;  %v63_v25 = vld [vmem:[#allocation2 + $0xb0] sm:$0xff]  ;;  %v2809_v26 = vsub.f32 %v59_v7, %v128_v10  ;;  %v64_v34 = vld [vmem:[#allocation2 + $0xb8] sm:$0xff] }
  0x17   :  { %v2806_v24 = vpack.c.bf16 %v131_v11, %v128_v10  ;;  %2414 = vmatprep.subr.bf16.mxu1 %v2794_v15  ;;  %v80_v27 = vand.u32 4294901760, %v43_v12  ;;  %v83_v28 = vand.u32 4294901760, %v44_v13  ;;  %v134_v29 = vand.u32 4294901760, %v61_v14  ;;  %v47_v35 = vld [vmem:[#allocation2 + $0x30] sm:$0xff]  ;;  %v48_v36 = vld [vmem:[#allocation2 + $0x38] sm:$0xff]  ;;  %v65_v41 = vld [vmem:[#allocation2 + $0xc0] sm:$0xff] }
  0x18   :  { %2416 = vmatpush3.bf16.msra.mxu1 %v2800_v21  ;;  %v2812_v30 = vsub.f32 %v60_v8, %v131_v11  ;;  %v137_v31 = vand.u32 4294901760, %v62_v18  ;;  %v86_v32 = vand.u32 4294901760, %v45_v19  ;;  %v89_v33 = vand.u32 4294901760, %v46_v20  ;;  %v66_v42 = vld [vmem:[#allocation2 + $0xc8] sm:$0xff]  ;;  %v49_v43 = vld [vmem:[#allocation2 + $0x40] sm:$0xff]  ;;  %v67_v57 = vld [vmem:[#allocation2 + $0xd0] sm:$0xff] }
  0x19   :  { %2418 = vmatprep.subr.bf16.mxu1 %v2806_v24  ;;  %v2815_v37 = vpack.c.bf16 %v83_v28, %v80_v27  ;;  %v2817_v38 = vsub.f32 %v43_v12, %v80_v27  ;;  %v2819_v39 = vsub.f32 %v44_v13, %v83_v28  ;;  %v140_v40 = vand.u32 4294901760, %v63_v25  ;;  %v50_v48 = vld [vmem:[#allocation2 + $0x48] sm:$0xff]  ;;  %v68_v58 = vld [vmem:[#allocation2 + $0xd8] sm:$0xff]  ;;  %v51_v63 = vld [vmem:[#allocation2 + $0x50] sm:$0xff] }
  0x1a   :  { %v2821_v44 = vpack.c.bf16 %v137_v31, %v134_v29  ;;  %v2823_v45 = vsub.f32 %v61_v14, %v134_v29  ;;  %v2825_v46 = vsub.f32 %v62_v18, %v137_v31  ;;  %v2827_v47 = vpack.c.bf16 %v89_v33, %v86_v32  ;;  %v52_v0 = vld [vmem:[#allocation2 + $0x58] sm:$0xff]  ;;  %v69_v1 = vld [vmem:[#allocation2 + $0xe0] sm:$0xff]  ;;  %v70_v6 = vld [vmem:[#allocation2 + $0xe8] sm:$0xff] }
  0x1b   :  { %v2829_v49 = vsub.f32 %v45_v19, %v86_v32  ;;  %v2831_v50 = vsub.f32 %v46_v20, %v89_v33  ;;  %v143_v51 = vand.u32 4294901760, %v64_v34  ;;  %v92_v52 = vand.u32 4294901760, %v47_v35  ;;  %v53_v7 = vld [vmem:[#allocation2 + $0x60] sm:$0xff]  ;;  %v54_v8 = vld [vmem:[#allocation2 + $0x68] sm:$0xff]  ;;  %v71_v29 = vld [vmem:[#allocation2 + $0xf0] sm:$0xff] }
  0x1c   :  { %3422 = vst [vmem:[#allocation5_spill] sm:$0xff] %v2821_v44  ;;  %3423 = vst [vmem:[#allocation6_spill] sm:$0xff] %v2827_v47  ;;  %2420 = vmatpush3.bf16.msra.mxu1 %v2815_v37  ;;  %v95_v53 = vand.u32 4294901760, %v48_v36  ;;  %v146_v54 = vand.u32 4294901760, %v65_v41  ;;  %v149_v55 = vand.u32 4294901760, %v66_v42  ;;  %v98_v56 = vand.u32 4294901760, %v49_v43 }
  0x1d   :  { %2422 = vmatprep.subr.bf16.mxu1 %v2821_v44  ;;  %v2835_v59 = vpack.c.bf16 %v143_v51, %v140_v40  ;;  %v2837_v60 = vsub.f32 %v63_v25, %v140_v40  ;;  %v2839_v61 = vsub.f32 %v64_v34, %v143_v51  ;;  %v101_v62 = vand.u32 4294901760, %v50_v48  ;;  %v56_v40 = vld [vmem:[#allocation2 + $0x78] sm:$0xff] }
  0x1e   :  { %v2841_v2 = vpack.c.bf16 %v95_v53, %v92_v52  ;;  %v2843_v3 = vsub.f32 %v47_v35, %v92_v52  ;;  %v2845_v4 = vsub.f32 %v48_v36, %v95_v53  ;;  %v2847_v5 = vpack.c.bf16 %v149_v55, %v146_v54  ;;  %v72_v35 = vld [vmem:[#allocation2 + $0xf8] sm:$0xff]  ;;  %v55_v36 = vld [vmem:[#allocation2 + $0x70] sm:$0xff]  ;;  %v31_v52 = vld [vmem:[%s3360_s0] sm:$0x3f] }
  0x1f   :  { %3424 = vst [vmem:[#allocation7_spill] sm:$0xff] %v2835_v59  ;;  %v2849_v9 = vsub.f32 %v65_v41, %v146_v54  ;;  %v2851_v10 = vsub.f32 %v66_v42, %v149_v55  ;;  %v2853_v11 = vpack.c.bf16 %v101_v62, %v98_v56  ;;  %v2855_v12 = vsub.f32 %v49_v43, %v98_v56 }
  0x20   :  { %3425 = vst [vmem:[#allocation8_spill] sm:$0xff] %v2841_v2  ;;  %3426 = vst [vmem:[#allocation9_spill] sm:$0xff] %v2847_v5  ;;  %2424 = vmatpush3.bf16.msra.mxu1 %v2827_v47  ;;  %v152_v13 = vand.u32 4294901760, %v67_v57  ;;  %v155_v14 = vand.u32 4294901760, %v68_v58  ;;  %v104_v18 = vand.u32 4294901760, %v51_v63  ;;  %v107_v19 = vand.u32 4294901760, %v52_v0 }
  0x21   :  { %3427 = vst [vmem:[#allocation10_spill] sm:$0xff] %v2853_v11  ;;  %2426 = vmatprep.subr.bf16.mxu1 %v2835_v59  ;;  %v158_v20 = vand.u32 4294901760, %v69_v1  ;;  %v161_v25 = vand.u32 4294901760, %v70_v6  ;;  %v110_v27 = vand.u32 4294901760, %v53_v7  ;;  %v113_v28 = vand.u32 4294901760, %v54_v8 }
  0x22   :  { %v2859_v31 = vsub.f32 %v50_v48, %v101_v62  ;;  %v2861_v32 = vpack.c.bf16 %v155_v14, %v152_v13  ;;  %v2863_v33 = vsub.f32 %v67_v57, %v152_v13  ;;  %v2865_v34 = vsub.f32 %v68_v58, %v155_v14  ;;  %v32_v48 = vld [vmem:[%s3360_s0 + $0x8] sm:$0x3f] }
  0x23   :  { %v2867_v41 = vpack.c.bf16 %v107_v19, %v104_v18  ;;  %v2869_v42 = vsub.f32 %v51_v63, %v104_v18  ;;  %v2871_v43 = vsub.f32 %v52_v0, %v107_v19  ;;  %v2873_v51 = vpack.c.bf16 %v161_v25, %v158_v20 }
  0x24   :  { %3428 = vst [vmem:[#allocation11_spill] sm:$0xff] %v2861_v32  ;;  %2428 = vmatpush3.bf16.msra.mxu1 %v2841_v2  ;;  %v2882_v53 = vsub.f32 %v69_v1, %v158_v20  ;;  %v2884_v54 = vsub.f32 %v70_v6, %v161_v25  ;;  %v2886_v55 = vpack.c.bf16 %v113_v28, %v110_v27  ;;  %v164_v57 = vand.u32 4294901760, %v71_v29 }
  0x25   :  { %3429 = vst [vmem:[#allocation12_spill] sm:$0xff] %v2867_v41  ;;  %3430 = vst [vmem:[#allocation13_spill] sm:$0xff] %v2873_v51  ;;  %v2888_v56 = vsub.f32 %v53_v7, %v110_v27  ;;  %2430 = vmatprep.subr.bf16.mxu1 %v2847_v5  ;;  %v167_v58 = vand.u32 4294901760, %v72_v35  ;;  %v116_v62 = vand.u32 4294901760, %v55_v36  ;;  %v119_v63 = vand.u32 4294901760, %v56_v40 }
  0x26   :  { %3431 = vst [vmem:[#allocation14_spill] sm:$0xff] %v2886_v55  ;;  %v34_v0 = vmax.f32 %v32_v48, 0.0  ;;  %v33_v13 = vmax.f32 %v31_v52, 0.0  ;;  %v3366_v14 = vand.u32 4294901760, %v2796_v16  ;;  %v3365_v18 = vand.u32 4294901760, %v2798_v17 }
  0x27   :  { %v2893_v1 = vsub.f32 %v54_v8, %v113_v28  ;;  %v2895_v6 = vpack.c.bf16 %v167_v58, %v164_v57  ;;  %v2897_v19 = vsub.f32 %v71_v29, %v164_v57  ;;  %v2899_v7 = vsub.f32 %v72_v35, %v167_v58 }
  0x28   :  { %2432 = vmatpush3.bf16.msra.mxu1 %v2853_v11  ;;  %v2902_v20 = vpack.c.bf16 %v119_v63, %v116_v62  ;;  %v2904_v25 = vsub.f32 %v55_v36, %v116_v62  ;;  %v36_v27 = vmin.f32 %v34_v0, 1.0  ;;  %v35_v48 = vmin.f32 %v33_v13, 1.0 }
  0x29   :  { %3432 = vst [vmem:[#allocation15_spill] sm:$0xff] %v2895_v6  ;;  %2434 = vmatprep.subr.bf16.mxu1 %v2861_v32  ;;  %v301_v8 = vsub.f32 %v2796_v16, %v3366_v14  ;;  %v308_v28 = vsub.f32 %v2798_v17, %v3365_v18  ;;  %v3371_v29 = vand.u32 4294901760, %v2802_v22  ;;  %v3374_v35 = vand.u32 4294901760, %v2804_v23 }
  0x2a   :  { %3433 = vst [vmem:[#allocation16_spill] sm:$0xff] %v2902_v20  ;;  %v38_v52 = vmul.f32 255.0, %v36_v27  ;;  %v37_v57 = vmul.f32 255.0, %v35_v48  ;;  %v2477_v36 = vpack.c.bf16 %v2798_v17, %v2796_v16  ;;  %v2479_v58 = vpack.c.bf16 %v2804_v23, %v2802_v22 }
  0x2b   :  { %v302_v62 = vand.u32 4294901760, %v301_v8  ;;  %v309_v0 = vand.u32 4294901760, %v308_v28  ;;  %v189_v13 = vsub.f32 %v2802_v22, %v3371_v29  ;;  %v196_v18 = vsub.f32 %v2804_v23, %v3374_v35 }
  0x2c   :  { %2436 = vmatpush3.bf16.msra.mxu1 %v2867_v41  ;;  %v40_v27 = vfloor.f32 %v38_v52  ;;  %v39_v48 = vfloor.f32 %v37_v57  ;;  %2478 = vmatprep.subr.bf16.mxu0 %v2477_v36  ;;  %v3379_v14 = vand.u32 4294901760, %v2809_v26  ;;  %v3378_v32 = vand.u32 4294901760, %v2812_v30 }
  0x2d   :  { %2438 = vmatprep.subr.bf16.mxu1 %v2873_v51  ;;  %v2929_v8 = vsub.f32 %v56_v40, %v119_v63  ;;  %v190_v28 = vand.u32 4294901760, %v189_v13  ;;  %v197_v11 = vand.u32 4294901760, %v196_v18  ;;  %2480 = vmatpush3.bf16.msra.mxu0 %v2479_v58  ;;  %v3377_v29 = vand.u32 4294901760, %v2817_v38 }
  0x2e   :  { %v2932_v5 = vand.u32 4294901760, %v40_v27  ;;  %v1965_v35 = vmul.f32 0.003921569, %v40_v27  ;;  %v2934_v41 = vand.u32 4294901760, %v39_v48  ;;  %v1964_v52 = vmul.f32 0.003921569, %v39_v48 }
  0x2f   :  { %v2445_v57 = vpack.c.bf16 %v309_v0, %v302_v62  ;;  %v315_v36 = vsub.f32 %v2809_v26, %v3379_v14  ;;  %v322_v40 = vsub.f32 %v2812_v30, %v3378_v32  ;;  %v203_v63 = vsub.f32 %v2817_v38, %v3377_v29 }
  0x30   :  { %2440 = vmatpush3.bf16.msra.mxu1 %v2886_v55  ;;  %v2947_v18 = vsub.f32 %v40_v27, %v2932_v5  ;;  %1968 = vst [vmem:[%s3364_s4 + $0x8] sm:$0x3f] %v1965_v35  ;;  %v2953_v58 = vsub.f32 %v39_v48, %v2934_v41  ;;  %1967 = vst [vmem:[%s3364_s4] sm:$0x3f] %v1964_v52  ;;  %v3382_v62 = vand.u32 4294901760, %v2819_v39  ;;  %v3391_v14 = vand.u32 4294901760, %v2823_v45 }
  0x31   :  { %v2481_v0 = vpack.c.bf16 %v2812_v30, %v2809_v26  ;;  %2442 = vmatprep.subr.bf16.mxu1 %v2895_v6  ;;  %v2447_v13 = vpack.c.bf16 %v197_v11, %v190_v28  ;;  %v316_v27 = vand.u32 4294901760, %v315_v36  ;;  %v323_v29 = vand.u32 4294901760, %v322_v40 }
  0x32   :  { %v2483_v35 = vpack.c.bf16 %v2819_v39, %v2817_v38  ;;  %v3383_v48 = vand.u32 4294901760, %v2947_v18  ;;  %v3386_v32 = vand.u32 4294901760, %v2953_v58  ;;  %v210_v52 = vsub.f32 %v2819_v39, %v3382_v62  ;;  %547 = vmatprep.mubr.f32.mxu0 %v2947_v18 }
  0x33   :  { %2482 = vmatprep.subr.bf16.mxu0 %v2481_v0  ;;  %v204_v6 = vand.u32 4294901760, %v203_v63  ;;  %v3396_v11 = vand.u32 4294901760, %v2825_v46  ;;  %v3397_v28 = vand.u32 4294901760, %v2829_v49  ;;  %v329_v63 = vsub.f32 %v2823_v45, %v3391_v14 }
  0x34   :  { %2484 = vmatpush3.bf16.msra.mxu0 %v2483_v35  ;;  %2444 = vmatpush3.bf16.msra.mxu1 %v2902_v20  ;;  %v172_v40 = vsub.f32 %v2947_v18, %v3383_v48  ;;  %v178_v0 = vsub.f32 %v2953_v58, %v3386_v32  ;;  %v211_v62 = vand.u32 4294901760, %v210_v52  ;;  %v3434_v48 = vand.u32 4294901760, %v2831_v50 }
  0x35   :  { %2446 = vmatprep.subr.bf16.mxu1 %v2445_v57  ;;  %v336_v35 = vsub.f32 %v2825_v46, %v3396_v11  ;;  %v217_v36 = vsub.f32 %v2829_v49, %v3397_v28  ;;  %v2485_v52 = vpack.c.bf16 %v2825_v46, %v2823_v45  ;;  %v2449_v51 = vpack.c.bf16 %v323_v29, %v316_v27 }
  0x36   :  { %v224_v20 = vsub.f32 %v2831_v50, %v3434_v48  ;;  %v173_v32 = vand.u32 4294901760, %v172_v40  ;;  %v179_v55 = vand.u32 4294901760, %v178_v0  ;;  %v330_v14 = vand.u32 4294901760, %v329_v63 }
  0x37   :  { %v2451_v57 = vpack.c.bf16 %v211_v62, %v204_v6  ;;  %v337_v2 = vand.u32 4294901760, %v336_v35  ;;  %v218_v59 = vand.u32 4294901760, %v217_v36  ;;  %2486 = vmatprep.subr.bf16.mxu0 %v2485_v52  ;;  %v2487_v11 = vpack.c.bf16 %v2831_v50, %v2829_v49 }
  0x38   :  { %174 = vmatprep.mubr.f32.mxu1 %v173_v32  ;;  %v3420_v28 = vand.u32 4294901760, %v2837_v60  ;;  %v3419_v47 = vand.u32 4294901760, %v2839_v61  ;;  %v3409_v48 = vand.u32 4294901760, %v2843_v3  ;;  %v3403_v44 = vand.u32 4294901760, %v2845_v4 }
  0x39   :  { %180 = vmatmul.mubr.f32.vlgmr.msra.gmra.mrb[0].mxu1 %v179_v55  ;;  %v2453_v40 = vpack.c.bf16 %v337_v2, %v330_v14  ;;  %v225_v29 = vand.u32 4294901760, %v224_v20  ;;  %2488 = vmatpush3.bf16.msra.mxu0 %v2487_v11  ;;  %v2489_v6 = vpack.c.bf16 %v2839_v61, %v2837_v60  ;;  %v3402_v62 = vand.u32 4294901760, %v2849_v9 }
  0x3a   :  { %2448 = vmatpush3.bf16.msra.mxu1 %v2447_v13  ;;  %v343_v32 = vsub.f32 %v2837_v60, %v3420_v28  ;;  %v350_v27 = vsub.f32 %v2839_v61, %v3419_v47  ;;  %v231_v2 = vsub.f32 %v2843_v3, %v3409_v48  ;;  %v238_v55 = vsub.f32 %v2845_v4, %v3403_v44 }
  0x3b   :  { %2450 = vmatprep.subr.bf16.mxu1 %v2449_v51  ;;  %2490 = vmatprep.subr.bf16.mxu0 %v2489_v6  ;;  %v2491_v14 = vpack.c.bf16 %v2845_v4, %v2843_v3  ;;  %v357_v20 = vsub.f32 %v2849_v9, %v3402_v62  ;;  %v3407_v13 = vand.u32 4294901760, %v2851_v10  ;;  %v3404_v11 = vand.u32 4294901760, %v2855_v12 }
  0x3c   :  { %v344_v36 = vand.u32 4294901760, %v343_v32  ;;  %v351_v0 = vand.u32 4294901760, %v350_v27  ;;  %v232_v63 = vand.u32 4294901760, %v231_v2  ;;  %v239_v35 = vand.u32 4294901760, %v238_v55  ;;  %410 = vmatprep.mubr.f32.mxu1 %v2932_v5 }
  0x3d   :  { %v2455_v52 = vpack.c.bf16 %v225_v29, %v218_v59  ;;  %2492 = vmatpush3.bf16.msra.mxu0 %v2491_v14  ;;  %v364_v51 = vsub.f32 %v2851_v10, %v3407_v13  ;;  %v245_v6 = vsub.f32 %v2855_v12, %v3404_v11  ;;  %v3406_v62 = vand.u32 4294901760, %v2859_v31 }
  0x3e   :  { %2452 = vmatpush3.bf16.msra.mxu1 %v2451_v57  ;;  %v2457_v44 = vpack.c.bf16 %v351_v0, %v344_v36  ;;  %v358_v32 = vand.u32 4294901760, %v357_v20  ;;  %v2493_v27 = vpack.c.bf16 %v2851_v10, %v2849_v9  ;;  %v2495_v59 = vpack.c.bf16 %v2859_v31, %v2855_v12 }
  0x3f   :  { %2454 = vmatprep.subr.bf16.mxu1 %v2453_v40  ;;  %v2459_v29 = vpack.c.bf16 %v239_v35, %v232_v63  ;;  %v365_v2 = vand.u32 4294901760, %v364_v51  ;;  %v252_v55 = vsub.f32 %v2859_v31, %v3406_v62  ;;  %v3405_v14 = vand.u32 4294901760, %v2863_v33 }
  0x40   :  { %2494 = vmatprep.subr.bf16.mxu0 %v2493_v27  ;;  %v3408_v57 = vand.u32 4294901760, %v2865_v34  ;;  %v3410_v20 = vand.u32 4294901760, %v2869_v42  ;;  %v3414_v36 = vand.u32 4294901760, %v2871_v43  ;;  %v2497_v0 = vpack.c.bf16 %v2865_v34, %v2863_v33 }
  0x41   :  { %v246_v11 = vand.u32 4294901760, %v245_v6  ;;  %v253_v40 = vand.u32 4294901760, %v252_v55  ;;  %2496 = vmatpush3.bf16.msra.mxu0 %v2495_v59  ;;  %v371_v63 = vsub.f32 %v2863_v33, %v3405_v14  ;;  %v2499_v35 = vpack.c.bf16 %v2871_v43, %v2869_v42 }
  0x42   :  { %2456 = vmatpush3.bf16.msra.mxu1 %v2455_v52  ;;  %v378_v51 = vsub.f32 %v2865_v34, %v3408_v57  ;;  %v259_v27 = vsub.f32 %v2869_v42, %v3410_v20  ;;  %v266_v6 = vsub.f32 %v2871_v43, %v3414_v36  ;;  %2498 = vmatprep.subr.bf16.mxu0 %v2497_v0  ;;  %v3413_v59 = vand.u32 4294901760, %v2882_v53 }
  0x43   :  { %2458 = vmatprep.subr.bf16.mxu1 %v2457_v44  ;;  %v2461_v55 = vpack.c.bf16 %v365_v2, %v358_v32  ;;  %v372_v14 = vand.u32 4294901760, %v371_v63  ;;  %v3411_v52 = vand.u32 4294901760, %v2884_v54  ;;  %v3412_v62 = vand.u32 4294901760, %v2888_v56 }
  0x44   :  { %v379_v13 = vand.u32 4294901760, %v378_v51  ;;  %v260_v57 = vand.u32 4294901760, %v259_v27  ;;  %v267_v48 = vand.u32 4294901760, %v266_v6  ;;  %v385_v20 = vsub.f32 %v2882_v53, %v3413_v59 }
  0x45   :  { %2500 = vmatpush3.bf16.msra.mxu0 %v2499_v35  ;;  %v392_v0 = vsub.f32 %v2884_v54, %v3411_v52  ;;  %v273_v44 = vsub.f32 %v2888_v56, %v3412_v62  ;;  %v3417_v32 = vand.u32 4294901760, %v2893_v1  ;;  %v2501_v2 = vpack.c.bf16 %v2884_v54, %v2882_v53 }
  0x46   :  { %2460 = vmatpush3.bf16.msra.mxu1 %v2459_v29  ;;  %v2463_v63 = vpack.c.bf16 %v253_v40, %v246_v11  ;;  %v2465_v51 = vpack.c.bf16 %v379_v13, %v372_v14  ;;  %v2503_v27 = vpack.c.bf16 %v2893_v1, %v2888_v56  ;;  %v386_v35 = vand.u32 4294901760, %v385_v20 }
  0x47   :  { %2462 = vmatprep.subr.bf16.mxu1 %v2461_v55  ;;  %v393_v6 = vand.u32 4294901760, %v392_v0  ;;  %v280_v52 = vsub.f32 %v2893_v1, %v3417_v32  ;;  %2502 = vmatprep.subr.bf16.mxu0 %v2501_v2  ;;  %v3415_v62 = vand.u32 4294901760, %v2897_v19  ;;  %v3416_v59 = vand.u32 4294901760, %v2899_v7 }
  0x48   :  { %v3418_v36 = vand.u32 4294901760, %v2904_v25  ;;  %v3421_v11 = vand.u32 4294901760, %v2929_v8  ;;  %v2505_v13 = vpack.c.bf16 %v2899_v7, %v2897_v19  ;;  %v2467_v29 = vpack.c.bf16 %v267_v48, %v260_v57 }
  0x49   :  { %v274_v14 = vand.u32 4294901760, %v273_v44  ;;  %2504 = vmatpush3.bf16.msra.mxu0 %v2503_v27  ;;  %v399_v20 = vsub.f32 %v2897_v19, %v3415_v62  ;;  %v2507_v40 = vpack.c.bf16 %v2929_v8, %v2904_v25  ;;  %v281_v55 = vand.u32 4294901760, %v280_v52 }
  0x4a   :  { %2464 = vmatpush3.bf16.msra.mxu1 %v2463_v63  ;;  %v406_v0 = vsub.f32 %v2899_v7, %v3416_v59  ;;  %v287_v2 = vsub.f32 %v2904_v25, %v3418_v36  ;;  %v294_v48 = vsub.f32 %v2929_v8, %v3421_v11  ;;  %2506 = vmatprep.subr.bf16.mxu0 %v2505_v13  ;;  %v3435_v27 = vand.u32 4294901760, %v2796_v16 }
  0x4b   :  { %2466 = vmatprep.subr.bf16.mxu1 %v2465_v51  ;;  %v2469_v57 = vpack.c.bf16 %v393_v6, %v386_v35  ;;  %v400_v44 = vand.u32 4294901760, %v399_v20  ;;  %v3436_v52 = vand.u32 4294901760, %v2798_v17  ;;  %v3437_v59 = vand.u32 4294901760, %v2802_v22 }
  0x4c   :  { %v407_v62 = vand.u32 4294901760, %v406_v0  ;;  %v3438_v32 = vand.u32 4294901760, %v2804_v23  ;;  %v2471_v47 = vpack.c.bf16 %v281_v55, %v274_v14  ;;  %v288_v28 = vand.u32 4294901760, %v287_v2  ;;  %v3458_v14 = vld [vmem:[#allocation5_spill] sm:$0xff] }
  0x4d   :  { %v2541_v63 = vpack.c.bf16 %v3436_v52, %v3435_v27  ;;  %2508 = vmatpush3.bf16.msra.mxu0 %v2507_v40  ;;  %v295_v11 = vand.u32 4294901760, %v294_v48  ;;  %v3439_v51 = vand.u32 4294901760, %v2809_v26  ;;  %v3440_v35 = vand.u32 4294901760, %v2812_v30 }
  0x4e   :  { %v2543_v36 = vpack.c.bf16 %v3438_v32, %v3437_v59  ;;  %2468 = vmatpush3.bf16.msra.mxu1 %v2467_v29  ;;  %v2473_v17 = vpack.c.bf16 %v407_v62, %v400_v44  ;;  %v3441_v22 = vand.u32 4294901760, %v2817_v38  ;;  %v3442_v23 = vand.u32 4294901760, %v2819_v39 }
  0x4f   :  { %2542 = vmatprep.subr.bf16.mxu0 %v2541_v63  ;;  %v2545_v16 = vpack.c.bf16 %v3440_v35, %v3439_v51  ;;  %2470 = vmatprep.subr.bf16.mxu1 %v2469_v57  ;;  %v2475_v32 = vpack.c.bf16 %v295_v11, %v288_v28  ;;  %v3443_v26 = vand.u32 4294901760, %v2823_v45  ;;  %v3444_v30 = vand.u32 4294901760, %v2825_v46  ;;  %v3475_v63 = vld [vmem:[#allocation12_spill] sm:$0xff]  ;;  %v3478_v51 = vld [vmem:[#allocation15_spill] sm:$0xff] }
  0x50   :  { %550 = vmatmul.mubr.f32.vlgmr.msra.gmra.mrb[0].mxu0 %v2953_v58  ;;  %v2547_v59 = vpack.c.bf16 %v3442_v23, %v3441_v22  ;;  %v3445_v62 = vand.u32 4294901760, %v2829_v49  ;;  %v3447_v39 = vand.u32 4294901760, %v2837_v60  ;;  %v3449_v45 = vand.u32 4294901760, %v2843_v3  ;;  %v938_v35 = vld [vmem:[%s3362_s2 + $0x10] sm:$0xff]  ;;  %v940_v23 = vld [vmem:[%s3362_s2 + $0x20] sm:$0xff] }
  0x51   :  { %2544 = vmatpush3.bf16.msra.mxu0 %v2543_v36  ;;  %824 = vmatprep.mubr.f32.mxu0 %v2932_v5  ;;  %v2549_v6 = vpack.c.bf16 %v3444_v30, %v3443_v26  ;;  %v3446_v36 = vand.u32 4294901760, %v2831_v50  ;;  %v3450_v46 = vand.u32 4294901760, %v2845_v4  ;;  %v3451_v50 = vand.u32 4294901760, %v2849_v9 }
  0x52   :  { %2472 = vmatpush3.bf16.msra.mxu1 %v2471_v47  ;;  %2546 = vmatprep.subr.bf16.mxu0 %v2545_v16  ;;  %v3448_v47 = vand.u32 4294901760, %v2839_v61  ;;  %v3452_v60 = vand.u32 4294901760, %v2851_v10  ;;  %v3453_v61 = vand.u32 4294901760, %v2947_v18  ;;  %v3454_v13 = vand.u32 4294901760, %v2855_v12  ;;  %v3461_v12 = vld [vmem:[#allocation6_spill] sm:$0xff] }
  0x53   :  { %2474 = vmatprep.subr.bf16.mxu1 %v2473_v17  ;;  %v2551_v38 = vpack.c.bf16 %v3446_v36, %v3445_v62  ;;  %v2555_v49 = vpack.c.bf16 %v3450_v46, %v3449_v45  ;;  %v3455_v3 = vand.u32 4294901760, %v2859_v31  ;;  %v3456_v29 = vand.u32 4294901760, %v2863_v33  ;;  %v3464_v33 = vld [vmem:[#allocation7_spill] sm:$0xff] }
  0x54   :  { %v2553_v28 = vpack.c.bf16 %v3448_v47, %v3447_v39  ;;  %v2557_v11 = vpack.c.bf16 %v3452_v60, %v3451_v50  ;;  %v3457_v9 = vand.u32 4294901760, %v2865_v34  ;;  %v3459_v18 = vand.u32 4294901760, %v2869_v42  ;;  %v3467_v42 = vld [vmem:[#allocation8_spill] sm:$0xff]  ;;  %v942_v36 = vld [vmem:[%s3362_s2 + $0x30] sm:$0xff] }
  0x55   :  { %2548 = vmatpush3.bf16.msra.mxu0 %v2547_v59  ;;  %v2559_v4 = vpack.c.bf16 %v3455_v3, %v3454_v13  ;;  %v3460_v20 = vand.u32 4294901760, %v2871_v43  ;;  %v3462_v31 = vand.u32 4294901760, %v2882_v53  ;;  %v3463_v55 = vand.u32 4294901760, %v2884_v54  ;;  %v3470_v53 = vld [vmem:[#allocation9_spill] sm:$0xff]  ;;  %v941_v59 = vld [vmem:[%s3362_s2 + $0x28] sm:$0xff] }
  0x56   :  { %2476 = vmatpush3.bf16.msra.mxu1 %v2475_v32  ;;  %2550 = vmatprep.subr.bf16.mxu0 %v2549_v6  ;;  %v2561_v10 = vpack.c.bf16 %v3457_v9, %v3456_v29  ;;  %v3465_v34 = vand.u32 4294901760, %v2888_v56  ;;  %v3466_v2 = vand.u32 4294901760, %v2893_v1  ;;  %v3468_v43 = vand.u32 4294901760, %v2897_v19  ;;  %v3473_v56 = vld [vmem:[#allocation10_spill] sm:$0xff]  ;;  %v3474_v1 = vld [vmem:[#allocation11_spill] sm:$0xff]  ;;  %v3476_v19 = vld [vmem:[#allocation13_spill] sm:$0xff] }
  0x57   :  { %2510 = vmatprep.subr.bf16.mxu1 %v2794_v15  ;;  %v2563_v40 = vpack.c.bf16 %v3460_v20, %v3459_v18  ;;  %v2565_v0 = vpack.c.bf16 %v3463_v55, %v3462_v31  ;;  %v3469_v57 = vand.u32 4294901760, %v2899_v7  ;;  %v3471_v54 = vand.u32 4294901760, %v2904_v25  ;;  %v3477_v7 = vld [vmem:[#allocation14_spill] sm:$0xff]  ;;  %v3479_v25 = vld [vmem:[#allocation16_spill] sm:$0xff] }
  0x58   :  { %v2567_v48 = vpack.c.bf16 %v3466_v2, %v3465_v34  ;;  %v3472_v27 = vand.u32 4294901760, %v2929_v8  ;;  %v3480_v8 = vand.u32 4294901760, %v2953_v58  ;;  %v2752_v58 = vmov 0.0|0.0  }
  0x59   :  { %412 = vmatmul.mubr.f32.vlgmr.msra.gmra.mrb[2].mxu1 %v2934_v41  ;;  %2552 = vmatpush3.bf16.msra.mxu0 %v2551_v38  ;;  %v2569_v44 = vpack.c.bf16 %v3469_v57, %v3468_v43  ;;  %v955_v16 = vand.u32 4294901760, %v938_v35  ;;  %v961_v32 = vand.u32 4294901760, %v940_v23  ;;  %v964_v26 = vand.u32 4294901760, %v941_v59  ;;  %v943_v38 = vld [vmem:[%s3362_s2 + $0x38] sm:$0xff] }
  0x5a   :  { %2512 = vmatpush3.bf16.msra.mxu1 %v2800_v21  ;;  %2554 = vmatprep.subr.bf16.mxu0 %v2553_v28  ;;  %v2571_v52 = vpack.c.bf16 %v3472_v27, %v3471_v54  ;;  %v967_v46 = vand.u32 4294901760, %v942_v36  ;;  %v2754_v50 = vmov 0.0   ;;  %vm1960_vm3 = vcmask 654336  }
  0x5b   :  { %2514 = vmatprep.subr.bf16.mxu1 %v2806_v24  ;;  %654 = vmatprep.mubr.f32.mxu1 %v3453_v61  ;;  %v3236_v62 = vpack.c.bf16 %v964_v26, %v961_v32  ;;  %v3244_v39 = vsub.f32 %v938_v35, %v955_v16  ;;  %v3249_v28 = vsub.f32 %v940_v23, %v961_v32  ;;  %vm1962_vm4 = vcmask 687104  }
  0x5c   :  { %v3251_v45 = vsub.f32 %v941_v59, %v964_v26  ;;  %v3262_v13 = vsub.f32 %v942_v36, %v967_v46 }
  0x5d   :  { %2556 = vmatpush3.bf16.msra.mxu0 %v2555_v49  ;;  %v970_v49 = vand.u32 4294901760, %v943_v38  ;;  %v1048_v9 = vand.u32 4294901760, %v3244_v39 }
  0x5e   :  { %2516 = vmatpush3.bf16.msra.mxu1 %v2815_v37  ;;  %2558 = vmatprep.subr.bf16.mxu0 %v2557_v11  ;;  %v1076_v57 = vand.u32 4294901760, %v3262_v13 }
  0x5f   :  { %2518 = vmatprep.subr.bf16.mxu1 %v3458_v14  ;;  %v3260_v61 = vpack.c.bf16 %v970_v49, %v967_v46  ;;  %v3264_v3 = vsub.f32 %v943_v38, %v970_v49  ;;  %v1049_v20 = vsub.f32 %v3244_v39, %v1048_v9 }
  0x60   :  { %v1077_v54 = vsub.f32 %v3262_v13, %v1076_v57 }
  0x61   :  { %2560 = vmatpush3.bf16.msra.mxu0 %v2559_v4  ;;  %v1050_v31 = vand.u32 4294901760, %v1049_v20 }
  0x62   :  { %2520 = vmatpush3.bf16.msra.mxu1 %v3461_v12  ;;  %2562 = vmatprep.subr.bf16.mxu0 %v2561_v10 }
  0x63   :  { %2522 = vmatprep.subr.bf16.mxu1 %v3464_v33 }
  0x65   :  { %2564 = vmatpush3.bf16.msra.mxu0 %v2563_v40 }
  0x66   :  { %2524 = vmatpush3.bf16.msra.mxu1 %v3467_v42  ;;  %2566 = vmatprep.subr.bf16.mxu0 %v2565_v0  ;;  %v1062_v0 = vand.u32 4294901760, %v3249_v28 }
  0x67   :  { %2526 = vmatprep.subr.bf16.mxu1 %v3470_v53 }
  0x68   :  { %v1063_v2 = vsub.f32 %v3249_v28, %v1062_v0 }
  0x69   :  { %2568 = vmatpush3.bf16.msra.mxu0 %v2567_v48 }
  0x6a   :  { %2528 = vmatpush3.bf16.msra.mxu1 %v3473_v56  ;;  %2570 = vmatprep.subr.bf16.mxu0 %v2569_v44  ;;  %v1083_v44 = vand.u32 4294901760, %v3264_v3 }
  0x6b   :  { %2530 = vmatprep.subr.bf16.mxu1 %v3474_v1 }
  0x6c   :  { %v1084_v27 = vsub.f32 %v3264_v3, %v1083_v44 }
  0x6d   :  { %2572 = vmatpush3.bf16.msra.mxu0 %v2571_v52  ;;  %v1078_v52 = vand.u32 4294901760, %v1077_v54 }
  0x6e   :  { %2532 = vmatpush3.bf16.msra.mxu1 %v3475_v63  ;;  %2605 = vmatprep.subr.bf16.mxu0 %v2752_v58 }
  0x6f   :  { %2534 = vmatprep.subr.bf16.mxu1 %v3476_v19 }
  0x70   :  { %826 = vmatmul.mubr.f32.vlgmr.msra.gmra.mrb[2].mxu0 %v2934_v41 }
  0x71   :  { %2273 = vmatprep.mubr.msk.f32.mxu0 %vm2753_vm0, %v2754_v50 }
  0x72   :  { %2536 = vmatpush3.bf16.msra.mxu1 %v3477_v7 }
  0x73   :  { %2538 = vmatprep.subr.bf16.mxu1 %v3478_v51 }
  0x76   :  { %2540 = vmatpush3.bf16.msra.mxu1 %v3479_v25 }
  0x77   :  { %2574 = vmatprep.subr.bf16.mxu1 %v2794_v15  ;;  %v936_v15 = vld [vmem:[%s3362_s2] sm:$0xff] }
  0x79   :  { %658 = vmatmul.mubr.f32.vlgmr.msra.gmra.mrb[4].mxu1 %v3480_v8  ;;  %v2636_v8 = vpack.c.bf16 %v3251_v45, %v3249_v28 }
  0x7a   :  { %2576 = vmatpush3.bf16.msra.mxu1 %v2800_v21  ;;  %928 = vmatprep.mubr.f32.mxu1 %v2932_v5  ;;  %v937_v21 = vld [vmem:[%s3362_s2 + $0x8] sm:$0xff] }
  0x7b   :  { %2578 = vmatprep.subr.bf16.mxu1 %v2806_v24  ;;  %v949_v24 = vand.u32 4294901760, %v936_v15 }
  0x7d   :  { %v3232_v30 = vsub.f32 %v936_v15, %v949_v24  ;;  %v2639_v15 = vpack.c.bf16 %v3264_v3, %v3262_v13 }
  0x7e   :  { %2580 = vmatpush3.bf16.msra.mxu1 %v2815_v37  ;;  %v952_v37 = vand.u32 4294901760, %v937_v21 }
  0x7f   :  { %2582 = vmatprep.subr.bf16.mxu1 %v3458_v14  ;;  %v1034_v60 = vand.u32 4294901760, %v3232_v30 }
  0x80   :  { %v3210_v5 = vpack.c.bf16 %v952_v37, %v949_v24  ;;  %v3234_v6 = vsub.f32 %v937_v21, %v952_v37 }
  0x81   :  { %v1035_v4 = vsub.f32 %v3232_v30, %v1034_v60 }
  0x82   :  { %2584 = vmatpush3.bf16.msra.mxu1 %v3461_v12  ;;  %2607 = vmatpush3.bf16.msra.mxu0 %v3210_v5  ;;  %v1041_v11 = vand.u32 4294901760, %v3234_v6 }
  0x83   :  { %2586 = vmatprep.subr.bf16.mxu1 %v3464_v33  ;;  %2608 = vmatprep.subr.bf16.mxu0 %v2752_v58  ;;  %v1036_v14 = vand.u32 4294901760, %v1035_v4  ;;  %v1069_v33 = vand.u32 4294901760, %v3251_v45 }
  0x84   :  { %v1042_v29 = vsub.f32 %v3234_v6, %v1041_v11  ;;  %v2654_v23 = vpack.c.bf16 %v1041_v11, %v1034_v60 }
  0x85   :  { %v1070_v48 = vsub.f32 %v3251_v45, %v1069_v33 }
  0x86   :  { %2588 = vmatpush3.bf16.msra.mxu1 %v3467_v42  ;;  %v1043_v18 = vand.u32 4294901760, %v1042_v29  ;;  %v1064_v42 = vand.u32 4294901760, %v1063_v2 }
  0x87   :  { %2590 = vmatprep.subr.bf16.mxu1 %v3470_v53  ;;  %v1071_v43 = vand.u32 4294901760, %v1070_v48 }
  0x88   :  { %v2618_v12 = vpack.c.bf16 %v1043_v18, %v1036_v14 }
  0x89   :  { %v2624_v53 = vpack.c.bf16 %v1071_v43, %v1064_v42 }
  0x8a   :  { %2592 = vmatpush3.bf16.msra.mxu1 %v3473_v56  ;;  %v1085_v56 = vand.u32 4294901760, %v1084_v27 }
  0x8b   :  { %2594 = vmatprep.subr.bf16.mxu1 %v3474_v1 }
  0x8c   :  { %v2627_v1 = vpack.c.bf16 %v1085_v56, %v1078_v52 }
  0x8e   :  { %2596 = vmatpush3.bf16.msra.mxu1 %v3475_v63 }
  0x8f   :  { %2598 = vmatprep.subr.bf16.mxu1 %v3476_v19 }
  0x92   :  { %2600 = vmatpush3.bf16.msra.mxu1 %v3477_v7 }
  0x93   :  { %2602 = vmatprep.subr.bf16.mxu1 %v3478_v51  ;;  %v2630_v51 = vpack.c.bf16 %v3234_v6, %v3232_v30  ;;  %v2660_v30 = vpack.c.bf16 %v1069_v33, %v1062_v0  ;;  %v2663_v6 = vpack.c.bf16 %v1083_v44, %v1076_v57 }
  0x96   :  { %2604 = vmatpush3.bf16.msra.mxu1 %v3479_v25 }
  0x97   :  { %2677 = vmatprep.subr.bf16.mxu1 %v2752_v58 }
  0x99   :  { %930 = vmatmul.mubr.f32.vlgmr.msra.gmra.mrb[6].mxu1 %v2934_v41  ;;  %v939_v41 = vld [vmem:[%s3362_s2 + $0x18] sm:$0xff] }
  0x9a   :  { %v958_v17 = vand.u32 4294901760, %v939_v41  ;;  %2375 = vmatprep.mubr.msk.f32.mxu1 %vm2753_vm0, %v2754_v50 }
  0x9c   :  { %v3222_v22 = vpack.c.bf16 %v958_v17, %v955_v16  ;;  %v3246_v47 = vsub.f32 %v939_v41, %v958_v17 }
  0x9e   :  { %2610 = vmatpush3.bf16.msra.mxu0 %v3222_v22  ;;  %v1055_v10 = vand.u32 4294901760, %v3246_v47  ;;  %v2633_v25 = vpack.c.bf16 %v3246_v47, %v3244_v39 }
  0x9f   :  { %2611 = vmatprep.subr.bf16.mxu0 %v2752_v58 }
  0xa0   :  { %v1056_v40 = vsub.f32 %v3246_v47, %v1055_v10  ;;  %v2657_v32 = vpack.c.bf16 %v1055_v10, %v1048_v9 }
  0xa2   :  { %2613 = vmatpush3.bf16.msra.mxu0 %v3236_v62  ;;  %v1057_v55 = vand.u32 4294901760, %v1056_v40  ;;  %v1487_v40 = vld [vmem:[%s3363_s3 + $0x8] sm:$0xff] }
  0xa3   :  { %2614 = vmatprep.subr.bf16.mxu0 %v2752_v58 }
  0xa4   :  { %v2621_v34 = vpack.c.bf16 %v1057_v55, %v1050_v31  ;;  %v1496_v31 = vand.u32 4294901760, %v1487_v40 }
  0xa6   :  { %2616 = vmatpush3.bf16.msra.mxu0 %v3260_v61  ;;  %v1578_v0 = vsub.f32 %v1487_v40, %v1496_v31 }
  0xa7   :  { %2617 = vmatprep.subr.bf16.mxu0 %v2752_v58 }
  0xa8   :  { %v1579_v33 = vand.u32 4294901760, %v1578_v0 }
 0x10c   :  { %v2007_v63 = vpop.f32.mrb[0].mxu1 }
 0x10d   :  { %v2008_v19 = vpop.f32.mrb[1].mxu1 }
 0x10e   :  { %v2009_v7 = vadd.f32 %v2008_v19, %v2007_v63 }
 0x110   :  { %v182_v16 = vadd.f32 0.5, %v2009_v7 }
 0x123   :  { %v2077_v21 = vpop.f32.mrb[0].mxu0 }
 0x124   :  { %v2078_v24 = vpop.f32.mrb[1].mxu0 }
 0x125   :  { %v2079_v37 = vadd.f32 %v2078_v24, %v2077_v21 }
 0x12c   :  { %v2042_v35 = vpop.f32.mrb[2].mxu1 }
 0x12d   :  { %v2043_v41 = vpop.f32.mrb[3].mxu1 }
 0x12e   :  { %v2044_v17 = vadd.f32 %v2043_v41, %v2042_v35 }
 0x130   :  { %v414_v59 = vadd.f32 %v2044_v17, %v182_v16 }
 0x132   :  { %v552_v26 = vadd.f32 %v2079_v37, %v414_v59 }
 0x143   :  { %v2147_v36 = vpop.f32.mrb[2].mxu0 }
 0x144   :  { %v2148_v38 = vpop.f32.mrb[3].mxu0 }
 0x145   :  { %v2149_v39 = vadd.f32 %v2148_v38, %v2147_v36 }
 0x14c   :  { %v2112_v47 = vpop.f32.mrb[4].mxu1 }
 0x14d   :  { %v2113_v28 = vpop.f32.mrb[5].mxu1 }
 0x14e   :  { %v2114_v45 = vadd.f32 %v2113_v28, %v2112_v47 }
 0x150   :  { %v660_v46 = vadd.f32 %v2114_v45, %v552_v26 }
 0x152   :  { %v828_v49 = vadd.f32 %v2149_v39, %v660_v46 }
 0x16c   :  { %v2182_v13 = vpop.f32.mrb[6].mxu1 }
 0x16d   :  { %v2183_v3 = vpop.f32.mrb[7].mxu1 }
 0x16e   :  { %v2184_v4 = vadd.f32 %v2183_v3, %v2182_v13 }
 0x170   :  { %v3290_v29 = vadd.f32 %v2184_v4, %v828_v49 }
 0x172   :  { %v935_v60 = vfloor.f32 %v3290_v29 }
 0x174   :  { %v946_v11 = vsel %vm944_vm1, %v935_v60, 0 }
 0x175   :  { %v1021_v9 = vand.u32 4294901760, %v946_v11 }
 0x177   :  { %v1022_v10 = vsub.f32 %v946_v11, %v1021_v9 }
 0x179   :  { %v1023_v14 = vand.u32 4294901760, %v1022_v10 }
 0x17b   :  { %v1024_v18 = vsub.f32 %v1022_v10, %v1023_v14 }
 0x17d   :  { %v1025_v20 = vand.u32 4294901760, %v1024_v18 }
 0x17f   :  { %2274 = vmatmul.mubr.f32.vlgmr.msra.gmra.mrb[4].mxu0 %v1025_v20 }
 0x180   :  { %2619 = vmatpush3.bf16.msra.mxu0 %v2618_v12  ;;  %2292 = vmatprep.mubr.msk.f32.mxu0 %vm2753_vm0, %v2754_v50 }
 0x181   :  { %2620 = vmatprep.subr.bf16.mxu0 %v2752_v58 }
 0x184   :  { %2622 = vmatpush3.bf16.msra.mxu0 %v2621_v34  ;;  %v1580_v34 = vsub.f32 %v1578_v0, %v1579_v33 }
 0x185   :  { %2623 = vmatprep.subr.bf16.mxu0 %v2752_v58 }
 0x186   :  { %v1581_v48 = vand.u32 4294901760, %v1580_v34 }
 0x188   :  { %2625 = vmatpush3.bf16.msra.mxu0 %v2624_v53 }
 0x189   :  { %2626 = vmatprep.subr.bf16.mxu0 %v2752_v58 }
 0x18c   :  { %2628 = vmatpush3.bf16.msra.mxu0 %v2627_v1 }
 0x18d   :  { %2629 = vmatprep.subr.bf16.mxu0 %v2752_v58 }
 0x18f   :  { %2293 = vmatmul.mubr.f32.vlgmr.msra.gmra.mrb[4].mxu0 %v1021_v9 }
 0x190   :  { %2631 = vmatpush3.bf16.msra.mxu0 %v2630_v51  ;;  %2311 = vmatprep.mubr.msk.f32.mxu0 %vm2753_vm0, %v2754_v50 }
 0x191   :  { %2632 = vmatprep.subr.bf16.mxu0 %v2752_v58 }
 0x194   :  { %2634 = vmatpush3.bf16.msra.mxu0 %v2633_v25 }
 0x195   :  { %2635 = vmatprep.subr.bf16.mxu0 %v2752_v58 }
 0x198   :  { %2637 = vmatpush3.bf16.msra.mxu0 %v2636_v8 }
 0x199   :  { %2638 = vmatprep.subr.bf16.mxu0 %v2752_v58 }
 0x19c   :  { %2640 = vmatpush3.bf16.msra.mxu0 %v2639_v15 }
 0x19d   :  { %2641 = vmatprep.subr.bf16.mxu0 %v2752_v58 }
 0x19f   :  { %2312 = vmatmul.mubr.f32.vlgmr.msra.gmra.mrb[4].mxu0 %v1022_v10 }
 0x1a0   :  { %2643 = vmatpush3.bf16.msra.mxu0 %v3210_v5  ;;  %2330 = vmatprep.mubr.msk.f32.mxu0 %vm2753_vm0, %v2754_v50 }
 0x1a1   :  { %2644 = vmatprep.subr.bf16.mxu0 %v2752_v58 }
 0x1a4   :  { %2646 = vmatpush3.bf16.msra.mxu0 %v3222_v22 }
 0x1a5   :  { %2647 = vmatprep.subr.bf16.mxu0 %v2752_v58 }
 0x1a8   :  { %2649 = vmatpush3.bf16.msra.mxu0 %v3236_v62 }
 0x1a9   :  { %2650 = vmatprep.subr.bf16.mxu0 %v2752_v58 }
 0x1ac   :  { %2652 = vmatpush3.bf16.msra.mxu0 %v3260_v61 }
 0x1ad   :  { %2653 = vmatprep.subr.bf16.mxu0 %v2752_v58 }
 0x1af   :  { %2331 = vmatmul.mubr.f32.vlgmr.msra.gmra.mrb[4].mxu0 %v1023_v14 }
 0x1b0   :  { %2655 = vmatpush3.bf16.msra.mxu0 %v2654_v23  ;;  %2349 = vmatprep.mubr.msk.f32.mxu0 %vm2753_vm0, %v2754_v50 }
 0x1b1   :  { %2656 = vmatprep.subr.bf16.mxu0 %v2752_v58 }
 0x1b4   :  { %2658 = vmatpush3.bf16.msra.mxu0 %v2657_v32 }
 0x1b5   :  { %2659 = vmatprep.subr.bf16.mxu0 %v2752_v58 }
 0x1b8   :  { %2661 = vmatpush3.bf16.msra.mxu0 %v2660_v30 }
 0x1b9   :  { %2662 = vmatprep.subr.bf16.mxu0 %v2752_v58 }
 0x1bc   :  { %2664 = vmatpush3.bf16.msra.mxu0 %v2663_v6 }
 0x1bd   :  { %2665 = vmatprep.subr.bf16.mxu0 %v2752_v58 }
 0x1bf   :  { %2350 = vmatmul.mubr.f32.vlgmr.msra.gmra.mrb[4].mxu0 %v1021_v9 }
 0x1c0   :  { %2667 = vmatpush3.bf16.msra.mxu0 %v3210_v5  ;;  %2368 = vmatprep.mubr.msk.f32.mxu0 %vm2753_vm0, %v2754_v50  ;;  %v1486_v5 = vld [vmem:[%s3363_s3] sm:$0xff]  ;;  %s2755_s3 = smov 64  }
 0x1c1   :  { %2668 = vmatprep.subr.bf16.mxu0 %v2752_v58  ;;  %v1493_v12 = vand.u32 4294901760, %v1486_v5 }
 0x1c3   :  { %v1571_v55 = vsub.f32 %v1486_v5, %v1493_v12 }
 0x1c4   :  { %2670 = vmatpush3.bf16.msra.mxu0 %v3222_v22  ;;  %v2678_v22 = vpack.c.bf16 %v1496_v31, %v1493_v12 }
 0x1c5   :  { %2671 = vmatprep.subr.bf16.mxu0 %v2752_v58  ;;  %v2684_v43 = vpack.c.bf16 %v1578_v0, %v1571_v55 }
 0x1c6   :  { %2679 = vmatpush3.bf16.msra.mxu1 %v2678_v22 }
 0x1c7   :  { %2680 = vmatprep.subr.bf16.mxu1 %v2752_v58 }
 0x1c8   :  { %2673 = vmatpush3.bf16.msra.mxu0 %v3236_v62  ;;  %v1572_v62 = vand.u32 4294901760, %v1571_v55 }
 0x1c9   :  { %2674 = vmatprep.subr.bf16.mxu0 %v2752_v58 }
 0x1ca   :  { %v2690_v57 = vpack.c.bf16 %v1579_v33, %v1572_v62 }
 0x1cc   :  { %2676 = vmatpush3.bf16.msra.mxu0 %v3260_v61  ;;  %v1573_v61 = vsub.f32 %v1571_v55, %v1572_v62 }
 0x1ce   :  { %v1574_v2 = vand.u32 4294901760, %v1573_v61 }
 0x1cf   :  { %2369 = vmatmul.mubr.f32.vlgmr.msra.gmra.mrb[4].mxu0 %v1021_v9 }
 0x1d0   :  { %v2681_v42 = vpack.c.bf16 %v1581_v48, %v1574_v2 }
 0x2a2   :  { %v1481_v44 = vpop.f32.mrb[4].mxu0 }
 0x2a3   :  { %v2695_v53 = vadd.f32 0.5, %v1481_v44  ;;  %v2370_v54 = vpop.f32.mrb[5].mxu0 }
 0x2a5   :  { %v1485_v27 = vfloor.f32 %v2695_v53 }
 0x2a7   :  { %v1490_v52 = vsel %vm1488_vm2, %v1485_v27, 0  ;;  %1952 = vrot.lane.b32.xlu0 %v1485_v27, %s2755_s3 }
 0x2a8   :  { %v1559_v56 = vand.u32 4294901760, %v1490_v52 }
 0x2aa   :  { %v1560_v1 = vsub.f32 %v1490_v52, %v1559_v56 }
 0x2ac   :  { %v1561_v63 = vand.u32 4294901760, %v1560_v1 }
 0x2ae   :  { %v1562_v19 = vsub.f32 %v1560_v1, %v1561_v63 }
 0x2b0   :  { %v1563_v7 = vand.u32 4294901760, %v1562_v19 }
 0x2b2   :  { %2376 = vmatmul.mubr.f32.vlgmr.msra.gmra.mrb[8].mxu1 %v1563_v7 }
 0x2b3   :  { %2682 = vmatpush3.bf16.msra.mxu1 %v2681_v42  ;;  %2382 = vmatprep.mubr.msk.f32.mxu1 %vm2753_vm0, %v2754_v50 }
 0x2b4   :  { %2683 = vmatprep.subr.bf16.mxu1 %v2752_v58 }
 0x2ba   :  { %2383 = vmatmul.mubr.f32.vlgmr.msra.gmra.mrb[8].mxu1 %v1559_v56 }
 0x2bb   :  { %2685 = vmatpush3.bf16.msra.mxu1 %v2684_v43  ;;  %2389 = vmatprep.mubr.msk.f32.mxu1 %vm2753_vm0, %v2754_v50 }
 0x2bc   :  { %2686 = vmatprep.subr.bf16.mxu1 %v2752_v58 }
 0x2c2   :  { %2390 = vmatmul.mubr.f32.vlgmr.msra.gmra.mrb[8].mxu1 %v1560_v1 }
 0x2c3   :  { %2688 = vmatpush3.bf16.msra.mxu1 %v2678_v22  ;;  %2396 = vmatprep.mubr.msk.f32.mxu1 %vm2753_vm0, %v2754_v50 }
 0x2c4   :  { %2689 = vmatprep.subr.bf16.mxu1 %v2752_v58 }
 0x2ca   :  { %2397 = vmatmul.mubr.f32.vlgmr.msra.gmra.mrb[8].mxu1 %v1561_v63 }
 0x2cb   :  { %2691 = vmatpush3.bf16.msra.mxu1 %v2690_v57  ;;  %2403 = vmatprep.mubr.msk.f32.mxu1 %vm2753_vm0, %v2754_v50 }
 0x2cc   :  { %2692 = vmatprep.subr.bf16.mxu1 %v2752_v58 }
 0x2d2   :  { %2404 = vmatmul.mubr.f32.vlgmr.msra.gmra.mrb[8].mxu1 %v1559_v56 }
 0x2d3   :  { %2694 = vmatpush3.bf16.msra.mxu1 %v2678_v22  ;;  %2410 = vmatprep.mubr.msk.f32.mxu1 %vm2753_vm0, %v2754_v50 }
 0x2da   :  { %2411 = vmatmul.mubr.f32.vlgmr.msra.gmra.mrb[8].mxu1 %v1559_v56 }
 0x319   :  { %v1953_v21 = vpop.permute.xlu0 %1952 }
 0x31a   :  { %v1959_v24 = vsel %vm944_vm1, %v935_v60, %v1953_v21 }
 0x3ad   :  { %v1947_v51 = vpop.f32.mrb[8].mxu1 }
 0x3ae   :  { %v2696_v25 = vadd.f32 0.5, %v1947_v51  ;;  %v2412_v8 = vpop.f32.mrb[9].mxu1 }
 0x3b0   :  { %v1951_v15 = vfloor.f32 %v2696_v25 }
 0x3b2   :  { %1956 = vrot.lane.b32.xlu0 %v1951_v15, %s2756_s28 }
 0x424   :  { %v1957_v58 = vpop.permute.xlu0 %1956 }
 0x425   :  { %v1961_v37 = vsel %vm1960_vm3, %v1959_v24, %v1957_v58 }
 0x426   :  { %v1963_v35 = vsel %vm1962_vm4, %v1961_v37, 0.0 }
 0x427   :  { %v1966_v41 = vmul.f32 0.003921569, %v1963_v35 }
 0x429   :  { %1969 = vst [vmem:[%s3364_s4 + $0x10] sm:$0x3f] %v1966_v41 }
 0x42a   :  { %1974 = vsyncpa [#allocation3], 1 }

</bundles_post_ra>
